<compile_context>
chip_gen: v5e
topology: v5e:2x2
jax: 0.10.0
libtpu: 0.0.40
codegen_flags: <defaults>
</compile_context>

<pallas_src>
import jax
import jax.numpy as jnp
from jax import lax
from jax.experimental import pallas as pl
from jax.experimental.pallas import tpu as pltpu


# ----------------------------- generation detection -----------------------------

def _tpu_generation():
    try:
        kind = jax.devices()[0].device_kind.lower()
    except Exception:
        return "other"
    if "v5 lite" in kind or "v5e" in kind or "v5litepod" in kind:
        return "v5e"
    if "v7" in kind:
        return "v7x"
    if "v6" in kind:
        return "v6e"
    return "other"


def _choose_tm(Np, scores_budget_bytes):
    """Largest power-of-two multiple of 128 that divides Np and keeps the f32
    (Np, Tm) scores tile within budget; floor is 128 (Np is a multiple of 128)."""
    candidates = []
    t = 128
    while t <= Np:
        if Np % t == 0:
            candidates.append(t)
        t *= 2
    in_budget = [t for t in candidates if Np * t * 4 <= scores_budget_bytes]
    return max(in_budget) if in_budget else min(candidates)


def _choose_tc(Np):
    """Projection column-tile width (bounds the f32 projection transient)."""
    for t in (512, 256, 128):
        if Np % t == 0:
            return t
    return Np  # unreachable: Np is always a multiple of 128


# ----------------------------------- kernel -----------------------------------

def _make_self_attn_kernel(C, C8p, K_rows, N, Np, Tm, Tc, exp_bf16):
    n_m = Np // Tm
    n_c = Np // Tc
    need_row_mask = Np > N

    def kernel(x_ref, w_ref, b_ref, gamma_ref, o_ref, qkv_sc):
        m = pl.program_id(1)

        # ---- fused Q/K/V projection, once per batch row, tiled over columns so
        # ---- the f32 transient is only (K_rows, Tc); result lands in ONE bf16 scratch.
        @pl.when(m == 0)
        def _():
            w = w_ref[...]                        # (K_rows, C) bf16
            b = b_ref[...]                        # (K_rows, 1) f32
            if n_c == 1:
                x_bf = x_ref[0].astype(jnp.bfloat16)                       # (C, Np)
                qkv = jnp.dot(w, x_bf, preferred_element_type=jnp.float32) + b
                qkv_sc[...] = qkv.astype(jnp.bfloat16)
            else:
                def proj_tile(j, carry):
                    col = pl.multiple_of(j * Tc, Tc)
                    x_t = x_ref[0, :, pl.ds(col, Tc)].astype(jnp.bfloat16)  # (C, Tc)
                    qkv_t = jnp.dot(w, x_t,
                                    preferred_element_type=jnp.float32) + b
                    qkv_sc[:, pl.ds(col, Tc)] = qkv_t.astype(jnp.bfloat16)
                    return carry
                lax.fori_loop(0, n_c, proj_tile, 0)

        if n_m == 1:
            col = 0
        else:
            col = pl.multiple_of(m * Tm, Tm)

        q = qkv_sc[0:C8p, :]                                   # (C8p, Np) bf16
        k_t = qkv_sc[C8p:2 * C8p, pl.ds(col, Tm)]              # (C8p, Tm) bf16
        v = qkv_sc[2 * C8p:K_rows, :]                          # (C,   Np) bf16

        # scores = q^T @ k without materializing the transpose (MXU trans_a).
        scores = lax.dot_general(
            q, k_t,
            dimension_numbers=(((0,), (0,)), ((), ())),
            preferred_element_type=jnp.float32)                # (Np, Tm) f32

        if need_row_mask:
            rows = lax.broadcasted_iota(jnp.int32, (Np, Tm), 0)
            scores = jnp.where(rows < N, scores, jnp.float32(-1e30))

        # F.softmax(dim=1) on (B, N, N) == softmax over axis 0 here; per-column
        # normalization commutes through the value contraction, so defer it.
        smax = jnp.max(scores, axis=0, keepdims=True)          # (1, Tm)
        if exp_bf16:
            # v6e/v7x: bf16 EUP; numerator and denominator share the same rounding.
            e = jnp.exp((scores - smax).astype(jnp.bfloat16))  # (Np, Tm) bf16
        else:
            e = jnp.exp(scores - smax).astype(jnp.bfloat16)    # (Np, Tm) bf16
        colsum = jnp.sum(e, axis=0, keepdims=True, dtype=jnp.float32)  # (1, Tm)

        out_un = jnp.dot(v, e, preferred_element_type=jnp.float32)     # (C, Tm)
        out = out_un * pl.reciprocal(colsum, approx=True)

        x_cols = x_ref[0, :, pl.ds(col, Tm)].astype(jnp.float32)       # (C, Tm)
        o_ref[0] = gamma_ref[0] * out + x_cols

    return kernel


# ----------------------------------- wrapper -----------------------------------

def self_attention_pallas(x_nchw, wq, wk, wv, bq, bk, bv, gamma, *, x_in_bf16=True):
    """x_nchw: (B, C, H, W) float32. Weights already spectral-normalized.

    x_in_bf16=True feeds x to the kernel in bf16 (halves HBM read / VMEM for the
    dominant input and the residual read); set False for a full-f32 input path.
    """
    B, C, H, W = x_nchw.shape
    N = H * W
    C8 = wq.shape[0]
    C8p = ((C8 + 15) // 16) * 16       # bf16 sublane-pair aligned q/k row padding
    K_rows = 2 * C8p + C

    gen = _tpu_generation()
    exp_bf16 = gen in ("v6e", "v7x")
    scores_budget = (4 << 20) if gen == "v7x" else (16 << 20)
    vmem_cap = (60 << 20) if gen == "v7x" else (100 << 20)

    # Pad N up to a lane multiple: keeps every matmul/store lane-dense and makes
    # awkward N (e.g. 96*96) tile cleanly instead of blowing VMEM.
    Np = ((N + 127) // 128) * 128
    Tm = _choose_tm(Np, scores_budget)
    Tc = _choose_tc(Np)
    n_m = Np // Tm

    x_dtype = jnp.bfloat16 if x_in_bf16 else jnp.float32
    x = x_nchw.reshape(B, C, N).astype(x_dtype)
    if Np != N:
        x = jnp.pad(x, ((0, 0), (0, 0), (0, Np - N)))

    # Stack (zero-padded) Wq / Wk / Wv into one projection weight; bf16 for the MXU.
    # Zero rows contribute 0 to q^T k, so results are exact.
    w_stk = jnp.zeros((K_rows, C), jnp.float32)
    w_stk = w_stk.at[0:C8].set(wq)
    w_stk = w_stk.at[C8p:C8p + C8].set(wk)
    w_stk = w_stk.at[2 * C8p:].set(wv)
    w_stk = w_stk.astype(jnp.bfloat16)

    b_stk = jnp.zeros((K_rows, 1), jnp.float32)
    b_stk = b_stk.at[0:C8, 0].set(bq)
    b_stk = b_stk.at[C8p:C8p + C8, 0].set(bk)
    b_stk = b_stk.at[2 * C8p:, 0].set(bv)

    gamma1 = jnp.reshape(gamma, (1,)).astype(jnp.float32)

    # VMEM working-set estimate -> vmem_limit_bytes (generation-aware ceiling).
    xbytes = 2 if x_in_bf16 else 4
    est = (2 * C * Np * xbytes                   # x block (double-buffered)
           + 2 * C * Tm * 4                      # out block (double-buffered)
           + 2 * K_rows * C * 2                  # stacked W (double-buffered)
           + 2 * K_rows * 128 * 4                # bias (lane-padded, double-buffered)
           + K_rows * Np * 2                     # qkv bf16 scratch
           + Np * Tm * 4                         # scores f32
           + Np * Tm * (2 if exp_bf16 else 6)    # e bf16 (+ f32 transient on v5e)
           + K_rows * Tc * 4 + C * Tc * 2        # projection-tile transients
           + 2 * C * Tm * 4)                     # out_un / out f32
    vmem_limit = int(min(max(int(est * 1.25), 32 << 20), vmem_cap))

    kernel = _make_self_attn_kernel(C, C8p, K_rows, N, Np, Tm, Tc, exp_bf16)

    out = pl.pallas_call(
        kernel,
        out_shape=jax.ShapeDtypeStruct((B, C, Np), jnp.float32),
        grid_spec=pltpu.PrefetchScalarGridSpec(
            num_scalar_prefetch=0,
            grid=(B, n_m),
            in_specs=[
                pl.BlockSpec((1, C, Np), lambda b, m: (b, 0, 0)),     # x (constant over m)
                pl.BlockSpec((K_rows, C), lambda b, m: (0, 0)),       # stacked W (bf16)
                pl.BlockSpec((K_rows, 1), lambda b, m: (0, 0)),       # stacked bias (f32)
                pl.BlockSpec(memory_space=pltpu.MemorySpace.SMEM),    # gamma scalar
            ],
            out_specs=pl.BlockSpec((1, C, Tm), lambda b, m: (b, 0, m)),
            scratch_shapes=[
                pltpu.VMEM((K_rows, Np), jnp.bfloat16),   # fused q/k/v scratch
            ],
        ),
        compiler_params=pltpu.CompilerParams(
            dimension_semantics=("parallel", "arbitrary"),
            vmem_limit_bytes=vmem_limit,
        ),
    )(x, w_stk, b_stk, gamma1)

    if Np != N:
        out = out[:, :, :N]
    return out.reshape(B, C, H, W)


# ------------------------- parameter setup (glue) -------------------------

def xavier_uniform(key, shape, gain=1.0):
    # shape = (out_ch, in_ch, 1) like a Conv1d weight
    fan_out, fan_in = shape[0], shape[1] * shape[2]
    a = gain * jnp.sqrt(6.0 / (fan_in + fan_out))
    return jax.random.uniform(key, shape, jnp.float32, -a, a)


def spectral_normalize(weight, u):
    """One power-iteration step; returns weight / sigma (matches SpectralNorm.compute_weight)."""
    w_mat = weight.reshape(weight.shape[0], -1)
    v = w_mat.T @ u
    v = v / jnp.linalg.norm(v)
    u_new = w_mat @ v
    u_new = u_new / jnp.linalg.norm(u_new)
    sigma = u_new @ w_mat @ v
    return weight / sigma


def self_attention_reference(x_nchw, wq, wk, wv, bq, bk, bv, gamma):
    B, C, H, W = x_nchw.shape
    N = H * W
    x = x_nchw.reshape(B, C, N)
    q = jnp.einsum('oc,bcn->bon', wq, x) + bq[None, :, None]
    k = jnp.einsum('oc,bcn->bon', wk, x) + bk[None, :, None]
    v = jnp.einsum('oc,bcn->bon', wv, x) + bv[None, :, None]
    query = jnp.transpose(q, (0, 2, 1))
    scores = jnp.einsum('bnc,bcm->bnm', query, k)
    attn = jax.nn.softmax(scores, axis=1)            # softmax over dim 1
    out = jnp.einsum('bcn,bnm->bcm', v, attn)
    return (gamma * out + x).reshape(B, C, H, W)


if __name__ == "__main__":
    key = jax.random.PRNGKey(0)
    B, C, H, W = 2, 32, 8, 8
    C8 = C // 8

    k_x, k_wq, k_wk, k_wv, k_uq, k_uk, k_uv = jax.random.split(key, 7)

    x = jax.random.normal(k_x, (B, C, H, W), jnp.float32)

    # Conv1d weights (out, in, 1), xavier-uniform init, zero bias (spectral_init)
    wq_orig = xavier_uniform(k_wq, (C8, C, 1))
    wk_orig = xavier_uniform(k_wk, (C8, C, 1))
    wv_orig = xavier_uniform(k_wv, (C, C, 1))
    u_q = jax.random.normal(k_uq, (C8,), jnp.float32)
    u_k = jax.random.normal(k_uk, (C8,), jnp.float32)
    u_v = jax.random.normal(k_uv, (C,), jnp.float32)

    # spectral-norm scaling (the forward_pre_hook), then squeeze the kernel dim
    wq = spectral_normalize(wq_orig, u_q)[:, :, 0]
    wk = spectral_normalize(wk_orig, u_k)[:, :, 0]
    wv = spectral_normalize(wv_orig, u_v)[:, :, 0]
    bq = jnp.zeros((C8,), jnp.float32)
    bk = jnp.zeros((C8,), jnp.float32)
    bv = jnp.zeros((C,), jnp.float32)
    # Module initializes gamma=0 (output == x); use a nonzero gamma so the
    # attention path is actually exercised by the correctness check.
    gamma = jnp.float32(0.5)

    out = self_attention_pallas(x, wq, wk, wv, bq, bk, bv, gamma)
    out = jax.block_until_ready(out)

    ref = self_attention_reference(x, wq, wk, wv, bq, bk, bv, gamma)
    assert out.shape == x.shape and out.dtype == jnp.float32
    # bf16 MXU operands / bf16 x / approx reciprocal -> relaxed tolerance vs f32 reference.
    assert jnp.allclose(out, ref, atol=5e-2, rtol=5e-2), "mismatch vs reference"

    print("KERNEL_OK")
</pallas_src>

<mosaic_0001>
module attributes {stable_mosaic.version = 11 : i64} {
  func.func @kernel(%arg0: i32, %arg1: i32, %arg2: memref<1x32x128xbf16, #tpu.memory_space<vmem>>, %arg3: memref<64x32xbf16, #tpu.memory_space<vmem>>, %arg4: memref<64x1xf32, #tpu.memory_space<vmem>>, %arg5: memref<1xf32, #tpu.memory_space<smem>>, %arg6: memref<1x32x128xf32, #tpu.memory_space<vmem>>, %arg7: memref<64x128xbf16, #tpu.memory_space<vmem>>) attributes {dimension_semantics = [#tpu.dimension_semantics<parallel>, #tpu.dimension_semantics<arbitrary>], iteration_bounds = array<i64: 2, 1>, scalar_prefetch = 0 : i64, scratch_operands = 1 : i64, tpu.core_type = #tpu.core_type<tc>, window_params = [{transform_indices = @transform_0, window_bounds = array<i64: 1, 32, 128>}, {pipeline_mode = #tpu.pipeline_mode<synchronous>, transform_indices = @transform_1, window_bounds = array<i64: 64, 32>}, {pipeline_mode = #tpu.pipeline_mode<synchronous>, transform_indices = @transform_2, window_bounds = array<i64: 64, 1>}, {transform_indices = @transform_3, window_bounds = array<i64: 1>}, {transform_indices = @transform_4, window_bounds = array<i64: 1, 32, 128>}]} {
    %c0_i32 = arith.constant 0 : i32
    %0 = arith.cmpi eq, %arg1, %c0_i32 : i32
    %1 = arith.extui %0 : i1 to i32
    %c0_i32_0 = arith.constant 0 : i32
    %2 = arith.cmpi ne, %1, %c0_i32_0 : i32
    scf.if %2 {
      %c0_15 = arith.constant 0 : index
      %c0_16 = arith.constant 0 : index
      %35 = vector.load %arg3[%c0_15, %c0_16] : memref<64x32xbf16, #tpu.memory_space<vmem>>, vector<64x32xbf16>
      %c0_17 = arith.constant 0 : index
      %c0_18 = arith.constant 0 : index
      %36 = vector.load %arg4[%c0_17, %c0_18] : memref<64x1xf32, #tpu.memory_space<vmem>>, vector<64x1xf32>
      %c0_19 = arith.constant 0 : index
      %c0_20 = arith.constant 0 : index
      %c0_21 = arith.constant 0 : index
      %37 = vector.load %arg2[%c0_19, %c0_20, %c0_21] : memref<1x32x128xbf16, #tpu.memory_space<vmem>>, vector<1x32x128xbf16>
      %38 = vector.shape_cast %37 : vector<1x32x128xbf16> to vector<32x128xbf16>
      %cst_22 = arith.constant dense<0.000000e+00> : vector<64x128xf32>
      %39 = tpu.matmul %35, %38, %cst_22 {dimension_numbers = #tpu.dot_dimension_numbers<[1], [0], [0], [1], [0, 0, 1, 1], [], []>} : vector<64x32xbf16>, vector<32x128xbf16>, vector<64x128xf32> -> vector<64x128xf32>
      %40 = vector.broadcast %36 : vector<64x1xf32> to vector<64x128xf32>
      %41 = arith.addf %39, %40 : vector<64x128xf32>
      %42 = arith.truncf %41 : vector<64x128xf32> to vector<64x128xbf16>
      %c0_23 = arith.constant 0 : index
      %c0_24 = arith.constant 0 : index
      %43 = vector.load %arg7[%c0_23, %c0_24] : memref<64x128xbf16, #tpu.memory_space<vmem>>, vector<64x128xbf16>
      tpu.vector_store %arg7[%c0_23, %c0_24], %42 {strides = array<i32>} : memref<64x128xbf16, #tpu.memory_space<vmem>>, vector<64x128xbf16>,
    } else {
    }
    %c0 = arith.constant 0 : index
    %c0_1 = arith.constant 0 : index
    %3 = vector.load %arg7[%c0, %c0_1] : memref<64x128xbf16, #tpu.memory_space<vmem>>, vector<16x128xbf16>
    %c16 = arith.constant 16 : index
    %c0_2 = arith.constant 0 : index
    %4 = vector.load %arg7[%c16, %c0_2] : memref<64x128xbf16, #tpu.memory_space<vmem>>, vector<16x128xbf16>
    %c32 = arith.constant 32 : index
    %c0_3 = arith.constant 0 : index
    %5 = vector.load %arg7[%c32, %c0_3] : memref<64x128xbf16, #tpu.memory_space<vmem>>, vector<32x128xbf16>
    %cst = arith.constant dense<0.000000e+00> : vector<128x128xf32>
    %6 = tpu.matmul %3, %4, %cst {dimension_numbers = #tpu.dot_dimension_numbers<[0], [0], [1], [1], [0, 1, 1, 1], [], []>} : vector<16x128xbf16>, vector<16x128xbf16>, vector<128x128xf32> -> vector<128x128xf32>
    %7 = tpu.iota {dimensions = array<i32: 0>} : vector<128x128xi32>
    %c64_i32 = arith.constant 64 : i32
    %8 = vector.broadcast %c64_i32 : i32 to vector<128x128xi32>
    %9 = arith.cmpi slt, %7, %8 : vector<128x128xi32>
    %cst_4 = arith.constant -1.000000e+30 : f32
    %10 = vector.broadcast %cst_4 : f32 to vector<128x128xf32>
    %11 = arith.select %9, %6, %10 : vector<128x128xi1>, vector<128x128xf32>
    %cst_5 = arith.constant dense<0xFF800000> : vector<128xf32>
    %12 = vector.multi_reduction <maximumf>, %11, %cst_5 [0] : vector<128x128xf32> to vector<128xf32>
    %13 = vector.shape_cast %12 : vector<128xf32> to vector<1x128xf32>
    %14 = vector.broadcast %13 : vector<1x128xf32> to vector<128x128xf32>
    %15 = arith.subf %11, %14 : vector<128x128xf32>
    %16 = math.exp %15 : vector<128x128xf32>
    %17 = arith.truncf %16 : vector<128x128xf32> to vector<128x128xbf16>
    %18 = arith.extf %17 : vector<128x128xbf16> to vector<128x128xf32>
    %cst_6 = arith.constant dense<0.000000e+00> : vector<128xf32>
    %19 = vector.multi_reduction <add>, %18, %cst_6 [0] : vector<128x128xf32> to vector<128xf32>
    %20 = vector.shape_cast %19 : vector<128xf32> to vector<1x128xf32>
    %cst_7 = arith.constant dense<0.000000e+00> : vector<32x128xf32>
    %21 = tpu.matmul %5, %17, %cst_7 {dimension_numbers = #tpu.dot_dimension_numbers<[1], [0], [0], [1], [0, 0, 1, 1], [], []>} : vector<32x128xbf16>, vector<128x128xbf16>, vector<32x128xf32> -> vector<32x128xf32>
    %22 = tpu.reciprocal %20 {approx = true} : vector<1x128xf32> -> vector<1x128xf32>
    %23 = vector.broadcast %22 : vector<1x128xf32> to vector<32x128xf32>
    %24 = arith.mulf %21, %23 : vector<32x128xf32>
    %c0_8 = arith.constant 0 : index
    %c0_9 = arith.constant 0 : index
    %c0_10 = arith.constant 0 : index
    %25 = vector.load %arg2[%c0_8, %c0_9, %c0_10] : memref<1x32x128xbf16, #tpu.memory_space<vmem>>, vector<1x32x128xbf16>
    %26 = vector.shape_cast %25 : vector<1x32x128xbf16> to vector<32x128xbf16>
    %27 = arith.extf %26 : vector<32x128xbf16> to vector<32x128xf32>
    %c0_11 = arith.constant 0 : index
    %28 = memref.load %arg5[%c0_11] : memref<1xf32, #tpu.memory_space<smem>>
    %29 = vector.broadcast %28 : f32 to vector<32x128xf32>
    %30 = arith.mulf %29, %24 : vector<32x128xf32>
    %31 = arith.addf %30, %27 : vector<32x128xf32>
    %c0_12 = arith.constant 0 : index
    %c0_13 = arith.constant 0 : index
    %c0_14 = arith.constant 0 : index
    %32 = vector.load %arg6[%c0_12, %c0_13, %c0_14] : memref<1x32x128xf32, #tpu.memory_space<vmem>>, vector<1x32x128xf32>
    %33 = vector.shape_cast %32 : vector<1x32x128xf32> to vector<32x128xf32>
    %34 = vector.shape_cast %31 : vector<32x128xf32> to vector<1x32x128xf32>
    tpu.vector_store %arg6[%c0_12, %c0_13, %c0_14], %34 {strides = array<i32>} : memref<1x32x128xf32, #tpu.memory_space<vmem>>, vector<1x32x128xf32>,
    return
  }
  func.func @transform_0(%arg0: i32, %arg1: i32) -> (i32, i32, i32) {
    %c0_i32 = arith.constant 0 : i32
    %c0_i32_0 = arith.constant 0 : i32
    %c0_i32_1 = arith.constant 0 : i32
    return %arg0, %c0_i32, %c0_i32_0 : i32, i32, i32
  }
  func.func @transform_1(%arg0: i32, %arg1: i32) -> (i32, i32) {
    %c0_i32 = arith.constant 0 : i32
    %c0_i32_0 = arith.constant 0 : i32
    %c0_i32_1 = arith.constant 0 : i32
    return %c0_i32, %c0_i32_0 : i32, i32
  }
  func.func @transform_2(%arg0: i32, %arg1: i32) -> (i32, i32) {
    %c0_i32 = arith.constant 0 : i32
    %c0_i32_0 = arith.constant 0 : i32
    %c0_i32_1 = arith.constant 0 : i32
    return %c0_i32, %c0_i32_0 : i32, i32
  }
  func.func @transform_3(%arg0: i32, %arg1: i32) -> i32 {
    %c0_i32 = arith.constant 0 : i32
    %c0_i32_0 = arith.constant 0 : i32
    return %c0_i32 : i32
  }
  func.func @transform_4(%arg0: i32, %arg1: i32) -> (i32, i32, i32) {
    %c0_i32 = arith.constant 0 : i32
    %c0_i32_0 = arith.constant 0 : i32
    return %arg0, %c0_i32, %arg1 : i32, i32, i32
  }
}

</mosaic_0001>

<bundles_post_ra>
// kernel: tpu_custom_call.1
= control target key start
LH: loop header
LB: loop body
LE: loop exit
PB: predicated region body
PF: predicated region fallthrough
CT: control target
= control target key end

     0   :  { %s1246_s0 = inlined_call_operand.vmem [shape: bf16[2,32,128], index: 0, kind: input, shape index: {}]   ;;  %s1247_s1 = inlined_call_operand.vmem [shape: bf16[64,32], index: 1, kind: input, shape index: {}]   ;;  %s1248_s2 = inlined_call_operand.vmem [shape: f32[64,1], index: 2, kind: input, shape index: {}]   ;;  %s1249_s3 = inlined_call_operand.<no memory space> [shape: f32[1], index: 3, kind: input, shape index: {}]   ;;  %s1250_s4 = inlined_call_operand.hbm [shape: f32[2,32,128], index: 4, kind: output, shape index: {}]  }
   0x1   :  { %9 = sst [smem:[#allocation3]] %s1249_s3 }
   0x2   :  { %10 = vsyncpa [#allocation5], 0 }
   0x3   :  { %12 = vsyncpa [#allocation5 + $0x1], 0  ;;  %s1088_s17 = smov 0   ;;  %s1090_s18 = smov 0  }
   0x4   :  { %s1092_s19 = smov 0   ;;  %s1094_s20 = smov 0  }
   0x5   :  { %s1096_s21 = smov 0   ;;  %s1098_s22 = smov 0  }
   0x6 LB: > { %s786_s3 = sadd.s32 4294967295, %s1055_s22   ;;  %s787_s23 = sadd.s32 4294967294, %s1055_s22   ;;  %s1055_s22 = sphi %s1098_s22, %s18_s22   ;;  %s1051_s21 = sphi %s1096_s21, %s1257_s21   ;;  %s1047_s20 = sphi %s1094_s20, %s1256_s20   ;;  %s1043_s19 = sphi %s1092_s19, %s1255_s19   ;;  %s1039_s18 = sphi %s1090_s18, %s1254_s18   ;;  %s1035_s17 = sphi %s1088_s17, %s1253_s17  }
   0x7   : > { %s30_s24 = sadd.s32 1, %s1051_s21  ;;  %s128_s25 = sadd.s32 1, %s1043_s19 }
   0x8   : > { %p32_p0 = scmp.ge.s32.totalorder %s30_s24, 2  ;;  %p138_p1 = scmp.ne.s32.totalorder %s1043_s19, %s1039_s18 }
   0x9   : > { %p139_p2 = scmp.eq.s32.totalorder %s786_s3, 1  ;;  %p144_p3 = scmp.ne.s32.totalorder %s1039_s18, %s1035_s17 }
   0xa   : > { %s1259_s24 = smov (%p32_p0, %s30_s24), 0  ;;  %p145_p5 = scmp.eq.s32.totalorder %s787_s23, 1 }
   0xb   : > { %p1128_p4 = por %p139_p2, %p138_p1  ;;  %s123_s27 = ssub.s32 %s1051_s21, %s1259_s24 }
   0xc   : > { %p790_p6 = scmp.ge.s32.totalorder %s1055_s22, 1  ;;  %p126_p7 = scmp.eq.s32.totalorder %s123_s27, 0 }
   0xd   : > { %p1135_p8 = por %p145_p5, %p144_p3  ;;  %p180_p9 = scmp.lt.s32.totalorder %s1055_s22, 3 }
   0xe   : > { %s1141_s29 = scalar_select %p126_p7, %s1043_s19, %s128_s25  }
   0xf   : > { %p181_p10 = pnand %p790_p6, %p180_p9 }
  0x10   : > { %p206_p11 = scmp.lt.s32.totalorder (!%p181_p10), %s1047_s20, 1  ;;  %s683_s3 = sld [smem:[#allocation3]] (!%p181_p10) }
  0x11   : > { %184 = sbr.rel (%p181_p10) target bundleno = 756 (0x2f4), region = 36  ;;  %s203_s23 = sand.u32 (!%p181_p10), 1, %s1039_s18  }
  0x12   : > { %s791_s25 = sshll.u32 (!%p181_p10), %s203_s23, 5  ;;  %s862_s30 = sshll.u32 (!%p181_p10), %s1047_s20, 5 }
  0x13   : > { %s205_s27 = scalar_lea.vmem (!%p181_p10), [#allocation4], %s791_s25  ;;  %s997_s14 = scalar_lea.hbm (!%p181_p10), %s1250_s4, 64 }
  0x14   : > { %s711_s8 = sshll.u32 (!%p181_p10), %s205_s27, 4  ;;  %s712_s8 = int_to_ptr.vmem [resolvable:$true] %s711_s8 }
  0x16   : > { %v224_v0 = vld [vmem:[%s1248_s2] sm:$0xff]  ;;  %v1057_v1 = vmov 0   ;;  %s207_s6 = scalar_select %p206_p11, %s1047_s20, 1  ;;  %v225_v3 = vld [vmem:[%s1248_s2 + $0x8] sm:$0xff]  ;;  %vm308_vm0 = vcmask 261120   ;;  %v231_v7 = vld [vmem:[%s1248_s2 + $0x38] sm:$0xff] }
  0x17   : > { %954 = vset.pattern.permute.xlu0 %v1057_v1  ;;  %955 = vset.pattern.permute.xlu1 %v1057_v1  ;;  %v852_v5 = vld [vmem:[%s1247_s1] sm:$0xff]  ;;  %v229_v6 = vld [vmem:[%s1248_s2 + $0x28] sm:$0xff]  ;;  %v226_v9 = vld [vmem:[%s1248_s2 + $0x10] sm:$0xff]  ;;  %vm402_vm1 = vcmask 130048  }
  0x18   : > { %238 = vperm.xlu0 %954, %v224_v0   ;;  %s851_s7 = sshll.u32 %s207_s6, 4  ;;  %v853_v8 = vld [vmem:[%s1247_s1 + $0x8] sm:$0xff]  ;;  %248 = vperm.xlu1 %955, %v226_v9   ;;  %v227_v10 = vld [vmem:[%s1248_s2 + $0x18] sm:$0xff]  ;;  %v854_v11 = vld [vmem:[%s1247_s1 + $0x10] sm:$0xff] }
  0x19   : > { %s1153_s10 = scalar_lea.vmem %s1246_s0, %s851_s7  ;;  %v230_v12 = vld [vmem:[%s1248_s2 + $0x30] sm:$0xff]  ;;  %v855_v13 = vld [vmem:[%s1247_s1 + $0x18] sm:$0xff]  ;;  %v228_v45 = vld [vmem:[%s1248_s2 + $0x20] sm:$0xff]  ;;  %s710_s7 = scalar_lea.hbm %s1250_s4, %s862_s30 }
  0x1a   : > { %v857_v2 = vld [vmem:[%s1153_s10 + $0x8] sm:$0xff]  ;;  %v856_v4 = vld [vmem:[%s1153_s10] sm:$0xff]  ;;  %s713_s9 = sshll.u32 %s710_s7, 4  ;;  %s714_s9 = int_to_ptr.hbm [resolvable:$true] %s713_s9 }
  0x1b   : > { %327 = vmatpush.bf16.msra.mxu0 %v857_v2  ;;  %s991_s20 = sshra.s32 %s714_s9, 4  ;;  %s992_s20 = int_to_ptr.hbm [resolvable:$true] %s991_s20 }
  0x1c   : > { %s993_s11 = scalar_lea.hbm %s992_s20, 32  ;;  %p998_p1 = scmp.lt.s32.totalorder %s992_s20, %s1250_s4 }
  0x1d   : > { %p994_p12 = scmp.ne.s32.totalorder %s992_s20, %s993_s11  ;;  %p999_p2 = scmp.lt.s32.totalorder %s997_s14, %s993_s11 }
  0x1f   : > { %328 = vmatpush.bf16.msra.mxu0 %v856_v4  ;;  %p995_p13 = pnand %p994_p12, %p1128_p4  ;;  %p1000_p3 = por %p999_p2, %p998_p1 }
  0x20   : > { %243 = vperm.xlu0 %954, %v225_v3   ;;  %253 = vperm.xlu1 %955, %v227_v10  }
  0x21   : > { %p996_p0 = pneg %p995_p13 }
  0x22   : > { %818 = vmatmul.msk.bf16.vlgmr.msra.gmra.mxu0 %vm308_vm0, %v852_v5 }
  0x23   : > { %p1001_p5 = pnand %p1000_p3, %p996_p0 }
  0x28   : > { %263 = vperm.xlu0 %954, %v229_v6   ;;  %268 = vperm.xlu1 %955, %v230_v12  }
  0x30   : > { %273 = vperm.xlu0 %954, %v231_v7  }
  0x32   : > { %819 = vmatmul.msk.bf16.gmra.mxu0 %vm308_vm0, %v853_v8 }
  0x42   : > { %820 = vmatmul.msk.bf16.gmra.mxu0 %vm308_vm0, %v854_v11 }
  0x52   : > { %821 = vmatmul.msk.bf16.gmra.mxu0 %vm308_vm0, %v855_v13 }
  0x8a   : > { %v239_v14 = vpop.permute.xlu0 %238  ;;  %v249_v21 = vpop.permute.xlu1 %248 }
  0x92   : > { %v244_v16 = vpop.permute.xlu0 %243  ;;  %v254_v26 = vpop.permute.xlu1 %253 }
  0x9a   : > { %v264_v31 = vpop.permute.xlu0 %263  ;;  %v269_v35 = vpop.permute.xlu1 %268 }
  0x9f   : > { %v330_v15 = vpop.f32.mrf.mxu0 }
  0xa0   : > { %v331_v18 = vadd.f32 %v330_v15, %v239_v14 }
  0xa2   : > { %v274_v37 = vpop.permute.xlu0 %273 }
  0xa7   : > { %v332_v17 = vpop.f32.mrf.mxu0 }
  0xa8   : > { %v333_v19 = vadd.f32 %v332_v17, %v244_v16 }
  0xaa   : > { %v866_v20 = vpack.c.bf16 %v333_v19, %v331_v18 }
  0xac   : > { %867 = vst [vmem:[#allocation2 + $0x10] sm:$0xff] %v866_v20  }
  0xaf   : > { %v335_v22 = vpop.f32.mrf.mxu0 }
  0xb0   : > { %v336_v24 = vadd.f32 %v335_v22, %v249_v21 }
  0xb3   : > { %v858_v23 = vld [vmem:[#allocation2 + $0x10] sm:$0xff] }
  0xb4   : > { %380 = vxpose.xlu2.c.b16.start.end [1/1] (short) %v858_v23, 128 }
  0xb7   : > { %v337_v25 = vpop.f32.mrf.mxu0 }
  0xb8   : > { %v338_v27 = vadd.f32 %v337_v25, %v254_v26 }
  0xba   : > { %v871_v28 = vpack.c.bf16 %v338_v27, %v336_v24 }
  0xbc   : > { %891 = vst [vmem:[#allocation2] sm:$0xff] %v871_v28  }
  0xbf   : > { %v340_v29 = vpop.f32.mrf.mxu0 }
  0xc3   : > { %v859_v30 = vld [vmem:[#allocation2] sm:$0xff] }
  0xc4   : > { %434 = vmatpush.bf16.msra.mxu1 %v859_v30  ;;  %895 = vmatpush.bf16.msra.mxu3 %v859_v30 }
  0xc7   : > { %v342_v32 = vpop.f32.mrf.mxu0 }
  0xc8   : > { %v343_v33 = vadd.f32 %v342_v32, %v264_v31 }
  0xcf   : > { %v345_v34 = vpop.f32.mrf.mxu0 }
  0xd0   : > { %v346_v36 = vadd.f32 %v345_v34, %v269_v35 }
  0xd7   : > { %v347_v38 = vpop.f32.mrf.mxu0 }
  0xd8   : > { %v348_v39 = vadd.f32 %v347_v38, %v274_v37 }
  0xda   : > { %v881_v40 = vpack.c.bf16 %v348_v39, %v346_v36 }
  0xdc   : > { %893 = vst [vmem:[#allocation2 + $0x8] sm:$0xff] %v881_v40  }
 0x116   : > { %956 = vset.pattern.permute.xlu2 %v1057_v1 }
 0x155   : > { %v388_v41 = vpop.trf.xlu2 }
 0x156   : > { %830 = vmatmul.msk.bf16.vlgmr.msra.gmra.mxu1 %vm402_vm1, %v388_v41 }
 0x165   : > { %v389_v42 = vpop.trf.xlu2 }
 0x166   : > { %831 = vmatmul.msk.bf16.gmra.mxu1 %vm402_vm1, %v389_v42 }
 0x175   : > { %v390_v43 = vpop.trf.xlu2 }
 0x176   : > { %832 = vmatmul.msk.bf16.gmra.mxu1 %vm402_vm1, %v390_v43 }
 0x185   : > { %v391_v44 = vpop.trf.xlu2 }
 0x186   : > { %833 = vmatmul.msk.bf16.gmra.mxu1 %vm402_vm1, %v391_v44 }
 0x18d   : > { %258 = vperm.xlu2 %956, %v228_v45  }
 0x195   : > { %v392_v46 = vpop.trf.xlu2 }
 0x196   : > { %834 = vmatmul.msk.bf16.vlgmr.msra.gmra.mxu3 %vm402_vm1, %v392_v46 }
 0x1a5   : > { %v393_v47 = vpop.trf.xlu2 }
 0x1a6   : > { %835 = vmatmul.msk.bf16.gmra.mxu3 %vm402_vm1, %v393_v47 }
 0x1b5   : > { %v394_v48 = vpop.trf.xlu2 }
 0x1b6   : > { %836 = vmatmul.msk.bf16.gmra.mxu3 %vm402_vm1, %v394_v48 }
 0x1c5   : > { %v395_v49 = vpop.trf.xlu2 }
 0x1c6   : > { %837 = vmatmul.msk.bf16.gmra.mxu3 %vm402_vm1, %v395_v49 }
 0x1d3   : > { %v436_v50 = vpop.f32.mrf.mxu1 }
 0x1db   : > { %v438_v51 = vpop.f32.mrf.mxu1 }
 0x1e3   : > { %v441_v52 = vpop.f32.mrf.mxu1 }
 0x1e7   : > { %v259_v53 = vpop.permute.xlu2 %258 }
 0x1e8   : > { %v341_v54 = vadd.f32 %v340_v29, %v259_v53 }
 0x1ea   : > { %v876_v55 = vpack.c.bf16 %v343_v33, %v341_v54 }
 0x1eb   : > { %v443_v56 = vpop.f32.mrf.mxu1 }
 0x1ec   : > { %892 = vst [vmem:[#allocation2 + $0x18] sm:$0xff] %v876_v55  }
 0x1f3   : > { %v446_v57 = vpop.f32.mrf.mxu1 }
 0x1f4   : > { %v525_v61 = vmax.f32 %v436_v50, %v446_v57 }
 0x1f6   : > { %v529_v1 = vmax.f32 %v525_v61, -1e+30 }
 0x1f8   : > { %v533_v6 = vmax.f32 %v529_v1, -1e+30 }
 0x1fb   : > { %v448_v58 = vpop.f32.mrf.mxu1 }
 0x1fc   : > { %v526_v60 = vmax.f32 %v438_v51, %v448_v58 }
 0x1fe   : > { %v530_v63 = vmax.f32 %v526_v60, -1e+30 }
 0x200   : > { %v534_v4 = vmax.f32 %v530_v63, -1e+30 }
 0x202   : > { %v537_v9 = vmax.f32 %v533_v6, %v534_v4 }
 0x203   : > { %v451_v59 = vpop.f32.mrf.mxu1 }
 0x204   : > { %v527_v62 = vmax.f32 %v441_v52, %v451_v59 }
 0x206   : > { %v531_v2 = vmax.f32 %v527_v62, -1e+30 }
 0x208   : > { %v535_v7 = vmax.f32 %v531_v2, -1e+30 }
 0x20b   : > { %v453_v0 = vpop.f32.mrf.mxu1 }
 0x20c   : > { %v528_v3 = vmax.f32 %v443_v56, %v453_v0 }
 0x20e   : > { %v532_v5 = vmax.f32 %v528_v3, -1e+30 }
 0x210   : > { %v536_v8 = vmax.f32 %v532_v5, -1e+30 }
 0x212   : > { %v538_v10 = vmax.f32 %v535_v7, %v536_v8 }
 0x214   : > { %v539_v11 = vmax.f32 %v537_v9, %v538_v10 }
 0x216   : > { %v540_v12 = vrot.slane %v539_v11, 4 }
 0x218   : > { %v541_v13 = vmax.f32 %v539_v11, %v540_v12 }
 0x219   : > { %v456_v14 = vpop.f32.mrf.mxu3 }
 0x21a   : > { %v542_v15 = vrot.slane %v541_v13, 2  ;;  %v860_v14 = vld [vmem:[#allocation2 + $0x18] sm:$0xff] }
 0x21c   : > { %v543_v16 = vmax.f32 %v541_v13, %v542_v15 }
 0x21e   : > { %v544_v17 = vrot.slane %v543_v16, 1 }
 0x220   : > { %v545_v18 = vmax.f32 %v543_v16, %v544_v17 }
 0x221   : > { %v458_v19 = vpop.f32.mrf.mxu3 }
 0x222   : > { %v554_v20 = vsub.f32 -1e+30, %v545_v18  ;;  %v548_v21 = vsub.f32 %v441_v52, %v545_v18  ;;  %v549_v23 = vsub.f32 %v443_v56, %v545_v18  ;;  %v546_v24 = vsub.f32 %v436_v50, %v545_v18 }
 0x223   : > { %v547_v25 = vsub.f32 %v438_v51, %v545_v18  ;;  %v550_v26 = vsub.f32 %v446_v57, %v545_v18  ;;  %v551_v28 = vsub.f32 %v448_v58, %v545_v18  ;;  %v553_v33 = vsub.f32 %v453_v0, %v545_v18 }
 0x224   : > { %v578_v22 = vmul.f32 1.442695, %v554_v20  ;;  %v566_v27 = vmul.f32 1.442695, %v548_v21  ;;  %v568_v29 = vmul.f32 1.442695, %v549_v23  ;;  %v552_v35 = vsub.f32 %v451_v59, %v545_v18 }
 0x225   : > { %v562_v30 = vmul.f32 1.442695, %v546_v24  ;;  %v564_v32 = vmul.f32 1.442695, %v547_v25  ;;  %v570_v34 = vmul.f32 1.442695, %v550_v26 }
 0x226   : > { %957 = vpow2.f32 %v578_v22  ;;  %v572_v36 = vmul.f32 1.442695, %v551_v28  ;;  %v576_v39 = vmul.f32 1.442695, %v553_v33  ;;  %v574_v40 = vmul.f32 1.442695, %v552_v35 }
 0x227   : > { %959 = vpow2.f32 %v566_v27  ;;  %v861_v20 = vld [vmem:[#allocation2 + $0x8] sm:$0xff]  ;;  %v884_v27 = vld [vmem:[%s1153_s10] sm:$0xff]  }
 0x228   : > { %961 = vpow2.f32 %v568_v29 }
 0x229   : > { %v461_v31 = vpop.f32.mrf.mxu3  ;;  %963 = vpow2.f32 %v562_v30  ;;  %v684_v30 = vstv %s683_s3 }
 0x22a   : > { %965 = vpow2.f32 %v564_v32  ;;  %v885_v32 = vunpack.c.l.bf16 %v884_v27 }
 0x22b   : > { %967 = vpow2.f32 %v570_v34 }
 0x22c   : > { %v958_v37 = vpop.eup %957  ;;  %969 = vpow2.f32 %v572_v36 }
 0x22d   : > { %v598_v38 = vpack.c.bf16 %v958_v37, %v958_v37  ;;  %v960_v41 = vpop.eup %959  ;;  %971 = vpow2.f32 %v576_v39  ;;  %v886_v37 = vunpack.c.h.bf16 %v884_v27 }
 0x22e   : > { %v962_v43 = vpop.eup %961  ;;  %973 = vpow2.f32 %v574_v40  ;;  %v894_v40 = vld [vmem:[%s1153_s10 + $0x8] sm:$0xff]   ;;  %s698_s10 = scalar_lea.sflag [#allocation5], %s203_s23 }
 0x22f   : > { %651 = vmatpush.bf16.msra.mxu2 %v598_v38  ;;  %v964_v44 = vpop.eup %963  ;;  %v595_v45 = vpack.c.bf16 %v962_v43, %v960_v41  ;;  %v610_v6 = vunpack.c.l.bf16 %v598_v38  ;;  %v611_v8 = vunpack.c.h.bf16 %v598_v38  ;;  %v889_v43 = vunpack.c.l.bf16 %v894_v40 }
 0x230   : > { %v966_v46 = vpop.eup %965 }
 0x231   : > { %v463_v42 = vpop.f32.mrf.mxu3  ;;  %v968_v47 = vpop.eup %967  ;;  %v594_v48 = vpack.c.bf16 %v966_v46, %v964_v44  ;;  %v604_v54 = vunpack.c.l.bf16 %v595_v45  ;;  %v605_v58 = vunpack.c.h.bf16 %v595_v45 }
 0x232   : > { %v970_v49 = vpop.eup %969 }
 0x233   : > { %652 = vmatpush.bf16.msra.mxu2 %v598_v38  ;;  %v602_v50 = vunpack.c.l.bf16 %v594_v48  ;;  %v603_v51 = vunpack.c.h.bf16 %v594_v48  ;;  %v972_v52 = vpop.eup %971  ;;  %v596_v53 = vpack.c.bf16 %v970_v49, %v968_v47 }
 0x234   : > { %v974_v57 = vpop.eup %973 }
 0x235   : > { %v618_v55 = vadd.f32 %v603_v51, %v602_v50  ;;  %v597_v60 = vpack.c.bf16 %v972_v52, %v974_v57  ;;  %v606_v61 = vunpack.c.l.bf16 %v596_v53  ;;  %v607_v63 = vunpack.c.h.bf16 %v596_v53 }
 0x237   : > { %653 = vmatpush.bf16.msra.mxu2 %v598_v38  ;;  %v619_v59 = vadd.f32 %v618_v55, %v604_v54  ;;  %v608_v1 = vunpack.c.l.bf16 %v597_v60  ;;  %v609_v4 = vunpack.c.h.bf16 %v597_v60 }
 0x239   : > { %v466_v56 = vpop.f32.mrf.mxu3  ;;  %v620_v62 = vadd.f32 %v619_v59, %v605_v58 }
 0x23b   : > { %654 = vmatpush.bf16.msra.mxu2 %v598_v38  ;;  %v621_v0 = vadd.f32 %v620_v62, %v606_v61 }
 0x23d   : > { %v622_v2 = vadd.f32 %v621_v0, %v607_v63 }
 0x23f   : > { %655 = vmatpush.bf16.msra.mxu2 %v597_v60  ;;  %v623_v5 = vadd.f32 %v622_v2, %v608_v1 }
 0x241   : > { %v468_v3 = vpop.f32.mrf.mxu3  ;;  %v624_v7 = vadd.f32 %v623_v5, %v609_v4 }
 0x243   : > { %656 = vmatpush.bf16.msra.mxu2 %v596_v53  ;;  %v625_v9 = vadd.f32 %v624_v7, %v610_v6 }
 0x245   : > { %v626_v10 = vadd.f32 %v625_v9, %v611_v8 }
 0x247   : > { %657 = vmatpush.bf16.msra.mxu2 %v595_v45  ;;  %v627_v12 = vadd.f32 %v626_v10, %v610_v6 }
 0x249   : > { %v471_v11 = vpop.f32.mrf.mxu3  ;;  %v628_v13 = vadd.f32 %v627_v12, %v611_v8 }
 0x24b   : > { %658 = vmatpush.bf16.msra.mxu2 %v594_v48  ;;  %v629_v15 = vadd.f32 %v628_v13, %v610_v6  ;;  %v890_v48 = vunpack.c.h.bf16 %v894_v40 }
 0x24d   : > { %v630_v16 = vadd.f32 %v629_v15, %v611_v8 }
 0x24e   : > { %659 = vmatmul.bf16.vlgmr.msra.gmra.mxu2 %v860_v14 }
 0x24f   : > { %v631_v18 = vadd.f32 %v630_v16, %v610_v6 }
 0x251   : > { %v473_v17 = vpop.f32.mrf.mxu3  ;;  %v632_v19 = vadd.f32 %v631_v18, %v611_v8 }
 0x253   : > { %v633_v21 = vrot.slane %v632_v19, 4 }
 0x255   : > { %v634_v22 = vadd.f32 %v633_v21, %v632_v19 }
 0x257   : > { %v635_v23 = vrot.slane %v634_v22, 2 }
 0x259   : > { %v636_v24 = vadd.f32 %v635_v23, %v634_v22 }
 0x25b   : > { %v637_v25 = vrot.slane %v636_v24, 1 }
 0x25d   : > { %v638_v26 = vadd.f32 %v637_v25, %v636_v24 }
 0x25e   : > { %664 = vmatmul.bf16.gmra.mxu2 %v861_v20 }
 0x25f   : > { %975 = vrcp.f32 %v638_v26 }
 0x265   : > { %v976_v28 = vpop.eup %975 }
 0x2d1   : > { %v660_v29 = vpop.f32.mrf.mxu2 }
 0x2d2   : > { %v671_v31 = vmul.f32 %v976_v28, %v660_v29 }
 0x2d4   : > { %v685_v33 = vmul.f32 %v684_v30, %v671_v31 }
 0x2d6   : > { %v689_v34 = vadd.f32 %v885_v32, %v685_v33 }
 0x2d8   : > { %693 = vst [vmem:[%s205_s27] sm:$0xff] %v689_v34 }
 0x2d9   : > { %v662_v35 = vpop.f32.mrf.mxu2 }
 0x2da   : > { %v672_v36 = vmul.f32 %v976_v28, %v662_v35 }
 0x2dc   : > { %v686_v38 = vmul.f32 %v684_v30, %v672_v36 }
 0x2de   : > { %v690_v39 = vadd.f32 %v886_v37, %v686_v38 }
 0x2e0   : > { %694 = vst [vmem:[%s205_s27 + $0x8] sm:$0xff] %v690_v39 }
 0x2e1   : > { %v665_v41 = vpop.f32.mrf.mxu2 }
 0x2e2   : > { %v673_v42 = vmul.f32 %v976_v28, %v665_v41 }
 0x2e4   : > { %v687_v44 = vmul.f32 %v684_v30, %v673_v42 }
 0x2e6   : > { %v691_v45 = vadd.f32 %v889_v43, %v687_v44 }
 0x2e8   : > { %695 = vst [vmem:[%s205_s27 + $0x10] sm:$0xff] %v691_v45 }
 0x2e9   : > { %v667_v46 = vpop.f32.mrf.mxu2 }
 0x2ea   : > { %v674_v47 = vmul.f32 %v976_v28, %v667_v46 }
 0x2ec   : > { %v688_v49 = vmul.f32 %v684_v30, %v674_v47 }
 0x2ee   : > { %v692_v50 = vadd.f32 %v890_v48, %v688_v49 }
 0x2f0   : > { %696 = vst [vmem:[%s205_s27 + $0x18] sm:$0xff] %v692_v50 }
 0x2f1   : > { %1004 = shalt.err (!%p1001_p5)
}
 0x2f2   : > { %s1058_s3 = smov 128   ;;  %s1059_s23 = smov 8  }
 0x2f3   : > { %896 = dma.vmem_to_hbm [thread:$0]  (%p1128_p4), %s712_s8, 512, %s714_s9, %s698_s10, %s1058_s3, %s1058_s3, %s1059_s23  }
 0x2f4 PF: > { %p902_p6 = scmp.ge.s32.totalorder %s1055_s22, 2  ;;  %s728_s25 = sand.u32 1, %s1035_s17  }
 0x2f5   : > { %s729_s27 = scalar_lea.sflag [#allocation5], %s728_s25 }
 0x2f6   : > { %p899_p7 = pnand %p902_p6, %p1135_p8 }
 0x2f8   : > { %p900_p9 = pneg %p899_p7 }
 0x2fa   : > { %1030 = dma.done.wait (%p900_p9), %s729_s27, 512  }
 0x2fb   : > { %1032 = vsyncadd (%p900_p9), %s729_s27, 4294966784  ;;  %s18_s22 = sadd.s32 1, %s1055_s22   ;;  %s1253_s17 = smov %s1039_s18 }
 0x2fc   : > { %p15_p10 = scmp.ge.s32.totalorder %s18_s22, 4   ;;  %s1254_s18 = smov %s1043_s19 }
 0x2fd   : > { %s1255_s19 = smov %s1141_s29  ;;  %s1256_s20 = smov %s1051_s21 }
 0x2fe   : > { %s1257_s21 = smov %s1259_s24  ;;  %17 = sbr.rel (!%p15_p10) target bundleno = 6 (0x6), region = 75 }
 0x303   :  { %735 = vsyncpa [#allocation5], 1 }
 0x304   :  { %737 = vsyncpa [#allocation5 + $0x1], 1 }

</bundles_post_ra>
